<compile_context>
chip_gen: v7x
topology: tpu7x:2x2x1
jax: 0.10.0
libtpu: 0.0.40
codegen_flags: <defaults>
</compile_context>

<pallas_src>
import math

import jax
import jax.numpy as jnp
from jax.experimental import pallas as pl
from jax.experimental.pallas import tpu as pltpu

_TWO_PI = 2.0 * math.pi


def _pos_emb_kernel(x_ref, c_ref, o_ref):
    # x_ref: (TB, 1)    f32  timestep values (batch on sublanes)
    # c_ref: (4, D)     f32  row0 = per-column raw frequency [0, w, w]
    #                        row1 = sin-column mask, row2 = cos-column mask,
    #                        row3 = one-hot for the raw-x passthrough column
    # o_ref: (TB, D)
    x = x_ref[...]                                     # (TB, 1)
    theta = x * c_ref[0:1, :] * _TWO_PI                # (TB, D)  VPU broadcast mul
    s = jnp.sin(theta)                                 # EUP
    c = jnp.cos(theta)                                 # EUP
    out = s * c_ref[1:2, :] + c * c_ref[2:3, :] + x * c_ref[3:4, :]
    o_ref[...] = out.astype(o_ref.dtype)


def sinusoidal_pos_emb(x, weights, *, block_b=2048, out_dtype=jnp.float32):
    """x: (B,) timesteps; weights: (half_dim,). Returns (B, 2*half_dim + 1)."""
    B = x.shape[0]
    half_dim = weights.shape[0]
    d_out = 2 * half_dim + 1

    w = weights.astype(jnp.float32)
    zero1 = jnp.zeros((1,), jnp.float32)
    zeros_h = jnp.zeros((half_dim,), jnp.float32)
    ones_h = jnp.ones((half_dim,), jnp.float32)

    w_full = jnp.concatenate([zero1, w, w])                      # frequencies (col 0 unused)
    m_sin = jnp.concatenate([zero1, ones_h, zeros_h])            # sin columns
    m_cos = jnp.concatenate([zero1, zeros_h, ones_h])            # cos columns
    m_x = jnp.concatenate([jnp.ones((1,), jnp.float32), zeros_h, zeros_h])  # raw-x column
    consts = jnp.stack([w_full, m_sin, m_cos, m_x], axis=0)      # (4, d_out), one DMA

    x_col = x.astype(jnp.float32).reshape(B, 1)

    # Small B: single block / single grid step (overhead-dominated regime).
    # Large B: tile with a sublane-aligned block and shard across cores.
    tb = B if B <= block_b else block_b
    grid = (pl.cdiv(B, tb),)

    return pl.pallas_call(
        _pos_emb_kernel,
        out_shape=jax.ShapeDtypeStruct((B, d_out), out_dtype),
        grid=grid,
        in_specs=[
            pl.BlockSpec((tb, 1), lambda i: (i, 0)),
            pl.BlockSpec((4, d_out), lambda i: (0, 0)),   # constant across grid steps
        ],
        out_specs=pl.BlockSpec((tb, d_out), lambda i: (i, 0)),
        compiler_params=pltpu.CompilerParams(
            dimension_semantics=("parallel",)),
    )(x_col, consts)


def sinusoidal_pos_emb_ref(x, weights):
    """Pure-JAX reference reproducing the PyTorch forward exactly."""
    x_col = x.astype(jnp.float32)[:, None]                                   # (B, 1)
    freqs = x_col * weights.astype(jnp.float32)[None, :] * 2.0 * math.pi     # (B, hd)
    fouriered = jnp.concatenate([jnp.sin(freqs), jnp.cos(freqs)], axis=-1)   # (B, 2hd)
    return jnp.concatenate([x_col, fouriered], axis=-1)                      # (B, 2hd+1)


if __name__ == "__main__":
    key = jax.random.PRNGKey(0)
    kx0, kw, kx1 = jax.random.split(key, 3)

    dim = 32                      # module dim (must be even); output width = dim + 1
    half_dim = dim // 2
    weights = jax.random.normal(kw, (half_dim,), dtype=jnp.float32)   # module parameter

    # Small batch: single-block path (grid=(1,)).
    B0 = 8
    x0 = jax.random.normal(kx0, (B0,), dtype=jnp.float32)
    y0 = jax.block_until_ready(sinusoidal_pos_emb(x0, weights))
    y0_ref = sinusoidal_pos_emb_ref(x0, weights)
    assert y0.shape == (B0, dim + 1)
    assert jnp.allclose(y0, y0_ref, atol=1e-4, rtol=1e-4), "small-batch mismatch"

    # Larger batch: tiled path (grid over B, parallel semantics, constant reused).
    B1 = 1024
    x1 = jax.random.normal(kx1, (B1,), dtype=jnp.float32)
    y1 = jax.block_until_ready(sinusoidal_pos_emb(x1, weights, block_b=256))
    y1_ref = sinusoidal_pos_emb_ref(x1, weights)
    assert y1.shape == (B1, dim + 1)
    assert jnp.allclose(y1, y1_ref, atol=1e-4, rtol=1e-4), "tiled-batch mismatch"

    print("KERNEL_OK")
</pallas_src>

<mosaic_0001>
module attributes {stable_mosaic.version = 11 : i64} {
  func.func @_pos_emb_kernel(%arg0: i32, %arg1: memref<8x1xf32, #tpu.memory_space<vmem>>, %arg2: memref<4x33xf32, #tpu.memory_space<vmem>>, %arg3: memref<8x33xf32, #tpu.memory_space<vmem>>) attributes {dimension_semantics = [#tpu.dimension_semantics<parallel>], iteration_bounds = array<i64: 1>, scalar_prefetch = 0 : i64, scratch_operands = 0 : i64, tpu.core_type = #tpu.core_type<tc>, window_params = [{transform_indices = @transform_0, window_bounds = array<i64: 8, 1>}, {pipeline_mode = #tpu.pipeline_mode<synchronous>, transform_indices = @transform_1, window_bounds = array<i64: 4, 33>}, {transform_indices = @transform_2, window_bounds = array<i64: 8, 33>}]} {
    %c0 = arith.constant 0 : index
    %c0_0 = arith.constant 0 : index
    %0 = vector.load %arg1[%c0, %c0_0] : memref<8x1xf32, #tpu.memory_space<vmem>>, vector<8x1xf32>
    %c0_1 = arith.constant 0 : index
    %c0_2 = arith.constant 0 : index
    %1 = vector.load %arg2[%c0_1, %c0_2] : memref<4x33xf32, #tpu.memory_space<vmem>>, vector<1x33xf32>
    %2 = vector.broadcast %0 : vector<8x1xf32> to vector<8x33xf32>
    %3 = vector.broadcast %1 : vector<1x33xf32> to vector<8x33xf32>
    %4 = arith.mulf %2, %3 : vector<8x33xf32>
    %cst = arith.constant 6.28318548 : f32
    %5 = vector.broadcast %cst : f32 to vector<8x33xf32>
    %6 = arith.mulf %4, %5 : vector<8x33xf32>
    %7 = math.sin %6 : vector<8x33xf32>
    %8 = math.cos %6 : vector<8x33xf32>
    %c1 = arith.constant 1 : index
    %c0_3 = arith.constant 0 : index
    %9 = vector.load %arg2[%c1, %c0_3] : memref<4x33xf32, #tpu.memory_space<vmem>>, vector<1x33xf32>
    %10 = vector.broadcast %9 : vector<1x33xf32> to vector<8x33xf32>
    %11 = arith.mulf %7, %10 : vector<8x33xf32>
    %c2 = arith.constant 2 : index
    %c0_4 = arith.constant 0 : index
    %12 = vector.load %arg2[%c2, %c0_4] : memref<4x33xf32, #tpu.memory_space<vmem>>, vector<1x33xf32>
    %13 = vector.broadcast %12 : vector<1x33xf32> to vector<8x33xf32>
    %14 = arith.mulf %8, %13 : vector<8x33xf32>
    %15 = arith.addf %11, %14 : vector<8x33xf32>
    %c3 = arith.constant 3 : index
    %c0_5 = arith.constant 0 : index
    %16 = vector.load %arg2[%c3, %c0_5] : memref<4x33xf32, #tpu.memory_space<vmem>>, vector<1x33xf32>
    %17 = vector.broadcast %0 : vector<8x1xf32> to vector<8x33xf32>
    %18 = vector.broadcast %16 : vector<1x33xf32> to vector<8x33xf32>
    %19 = arith.mulf %17, %18 : vector<8x33xf32>
    %20 = arith.addf %15, %19 : vector<8x33xf32>
    %c0_6 = arith.constant 0 : index
    %c0_7 = arith.constant 0 : index
    %21 = vector.load %arg3[%c0_6, %c0_7] : memref<8x33xf32, #tpu.memory_space<vmem>>, vector<8x33xf32>
    tpu.vector_store %arg3[%c0_6, %c0_7], %20 {strides = array<i32>} : memref<8x33xf32, #tpu.memory_space<vmem>>, vector<8x33xf32>,
    return
  }
  func.func @transform_0(%arg0: i32) -> (i32, i32) {
    %c0_i32 = arith.constant 0 : i32
    %c0_i32_0 = arith.constant 0 : i32
    return %arg0, %c0_i32 : i32, i32
  }
  func.func @transform_1(%arg0: i32) -> (i32, i32) {
    %c0_i32 = arith.constant 0 : i32
    %c0_i32_0 = arith.constant 0 : i32
    %c0_i32_1 = arith.constant 0 : i32
    return %c0_i32, %c0_i32_0 : i32, i32
  }
  func.func @transform_2(%arg0: i32) -> (i32, i32) {
    %c0_i32 = arith.constant 0 : i32
    %c0_i32_0 = arith.constant 0 : i32
    return %arg0, %c0_i32 : i32, i32
  }
}

</mosaic_0001>

<bundles_post_ra>
// kernel: tpu_custom_call.1
= control target key start
LH: loop header
LB: loop body
LE: loop exit
PB: predicated region body
PF: predicated region fallthrough
CT: control target
= control target key end

     0   :  { %v321_v1 = vmov 0   ;;  %s396_s0 = inlined_call_operand.vmem [shape: f32[8,1], index: 0, kind: input, shape index: {}]   ;;  %s397_s1 = inlined_call_operand.vmem [shape: f32[4,33], index: 1, kind: input, shape index: {}]   ;;  %s398_s2 = inlined_call_operand.hbm [shape: f32[8,33], index: 2, kind: output, shape index: {}]  }
   0x1   :  { %v12_v0 = vld [vmem:[%s396_s0] sm:$0xff]  ;;  %292 = vset.pattern.permute.xlu0 %v321_v1 }
   0x2   :  { %16 = vperm.xlu0 %292, %v12_v0  }
   0x3   :  { %7 = vsyncpa [#allocation3], 0  ;;  %v268_v2 = vld [vmem:[%s397_s1] ss:$0 sm:$0xff]  ;;  %v322_v16 = vmov 683565275  }
   0x4   :  { %v323_v18 = vmov 2475754826   ;;  %v324_v21 = vmov 2131351028   ;;  %v325_v24 = vmov 2102212464  }
   0x5   :  { %v326_v27 = vmov 920167782   ;;  %v327_v30 = vmov 1326507024   ;;  %s328_s18 = smov [#allocation2]  }
   0x6   :  { %s260_s19 = sshll.u32 %s328_s18, 4  ;;  %s261_s19 = int_to_ptr.vmem [resolvable:$true] %s260_s19 }
   0x7   :  { %s297_s20 = scalar_lea.vmem %s261_s19, 128  ;;  %p302_p1 = scmp.lt.s32.totalorder %s261_s19, %s261_s19 }
   0x8   :  { %p298_p0 = scmp.ne.s32.totalorder %s261_s19, %s297_s20  ;;  %p303_p2 = scmp.lt.s32.totalorder %s297_s20, %s297_s20 }
   0xa   :  { %p304_p3 = por %p303_p2, %p302_p1 }
   0xc   :  { %p305_p4 = pnand %p304_p3, %p298_p0 }
  0x81   :  { %v350_v3 = vpop.permute.xlu0 %16 }
  0x82   :  { %v23_v4 = vmul.f32 %v268_v2, %v350_v3 }
  0x84   :  { %v353_v5 = vmul.f32 6.2831855, %v23_v4 }
  0x86   :  { %v28_v6 = vand.u32 2139095040, %v353_v5  ;;  %v25_v10 = vand.u32 2147483647, %v353_v5  ;;  %vm27_vm7 = vcmp.lt.s32.totalorder %v353_v5, 0  ;;  %vm117_vm15 = vweird.f32 %v353_v5 }
  0x88   :  { %v29_v7 = vshrl.u32 %v28_v6, 23  ;;  %v32_v13 = vand.u32 8388607, %v25_v10  ;;  %vm26_vm8 = vcmp.le.f32.partialorder %v25_v10, 0.7853982 }
  0x8a   :  { %v269_v8 = vadd.s32 4294967169, %v29_v7  ;;  %v33_v32 = vor.u32 8388608, %v32_v13 }
  0x8c   :  { %v35_v9 = vadd.s32 1, %v269_v8  ;;  %v73_v46 = vshll.u32 %v33_v32, 8 }
  0x8e   :  { %vm36_vm0 = vcmp.gt.s32.totalorder %v35_v9, 0 }
  0x8f   :  { %v37_v11 = vsel %vm36_vm0, %v35_v9, 0  ;;  %vm252_vm0 = vcmask 269312  }
  0x90   :  { %v39_v12 = vand.u32 31, %v37_v11  ;;  %v38_v15 = vshrl.u32 %v37_v11, 5 }
  0x92   :  { %v40_v14 = vsub.s32 32, %v39_v12  ;;  %v42_v17 = vshll.u32 %v322_v16, %v39_v12  ;;  %v45_v19 = vshll.u32 %v323_v18, %v39_v12  ;;  %v48_v23 = vshll.u32 %v324_v21, %v39_v12 }
  0x93   :  { %v51_v26 = vshll.u32 %v325_v24, %v39_v12  ;;  %v54_v29 = vshll.u32 %v326_v27, %v39_v12  ;;  %vm57_vm1 = vcmp.lt.s32.totalorder %v38_v15, 1  ;;  %vm60_vm2 = vcmp.lt.s32.totalorder %v38_v15, 4 }
  0x94   :  { %v43_v20 = vshrl.u32 %v323_v18, %v40_v14  ;;  %v46_v22 = vshrl.u32 %v324_v21, %v40_v14  ;;  %v49_v25 = vshrl.u32 %v325_v24, %v40_v14  ;;  %v52_v28 = vshrl.u32 %v326_v27, %v40_v14 }
  0x95   :  { %v55_v31 = vshrl.u32 %v327_v30, %v40_v14  ;;  %v41_v41 = vshrl.u32 %v322_v16, %v40_v14  ;;  %vm59_vm3 = vcmp.lt.s32.totalorder %v38_v15, 3  ;;  %vm58_vm4 = vcmp.lt.s32.totalorder %v38_v15, 2 }
  0x96   :  { %v44_v33 = vor.u32 %v43_v20, %v42_v17  ;;  %v47_v34 = vor.u32 %v46_v22, %v45_v19  ;;  %v50_v35 = vor.u32 %v49_v25, %v48_v23  ;;  %v53_v36 = vor.u32 %v52_v28, %v51_v26 }
  0x97   :  { %v56_v37 = vor.u32 %v55_v31, %v54_v29 }
  0x98   :  { %v62_v38 = vsel %vm60_vm2, %v50_v35, 2102212464  ;;  %v65_v39 = vsel %vm57_vm1, %v44_v33, %v47_v34  ;;  %v69_v40 = vsel %vm57_vm1, %v47_v34, %v50_v35  ;;  %v66_v42 = vsel %vm60_vm2, %v53_v36, 920167782 }
  0x99   :  { %v70_v43 = vsel %vm60_vm2, %v56_v37, 1326507024  ;;  %v67_v44 = vsel %vm59_vm3, %v50_v35, %v66_v42  ;;  %v61_v47 = vsel %vm57_vm1, %v41_v41, %v44_v33  ;;  %v63_v48 = vsel %vm59_vm3, %v47_v34, %v62_v38  ;;  %v277_v34 = vld [vmem:[%s397_s1 + $0x1] ss:$0 sm:$0xff]  ;;  %v278_v35 = vld [vmem:[%s397_s1 + $0x2] ss:$0 sm:$0xff] }
  0x9a   :  { %v71_v45 = vsel %vm59_vm3, %v53_v36, %v70_v43  ;;  %v68_v49 = vsel %vm58_vm4, %v65_v39, %v67_v44  ;;  %v64_v55 = vsel %vm58_vm4, %v61_v47, %v63_v48 }
  0x9b   :  { %v72_v50 = vsel %vm58_vm4, %v69_v40, %v71_v45  ;;  %v362_v53 = vmul.u32.u64.low %v73_v46, %v68_v49  ;;  %v363_v54 = vmul.u32.u64.high %v73_v46, %v68_v49, %v362_v53  ;;  %v80_v57 = vmul.u32 %v73_v46, %v64_v55  ;;  %v279_v40 = vld [vmem:[%s397_s1 + $0x3] ss:$0 sm:$0xff] }
  0x9c   :  { %v359_v51 = vmul.u32.u64.low %v73_v46, %v72_v50  ;;  %v360_v52 = vmul.u32.u64.high %v73_v46, %v72_v50, %v359_v51  ;;  %v250_v46 = vmul.f32 %v279_v40, %v350_v3 }
  0x9d   :  { %v83_v56 = vadd.s32 1, %v363_v54 }
  0x9e   :  { %vm82_vm5 = vc.u32 %v360_v52, %v362_v53  ;;  %v81_v7 = vadd.s32 %v362_v53, %v360_v52 }
  0x9f   :  { %v84_v58 = vsel %vm82_vm5, %v83_v56, %v363_v54 }
  0xa0   :  { %v85_v59 = vadd.s32 %v84_v58, %v80_v57 }
  0xa2   :  { %v86_v60 = vadd.s32 536870912, %v85_v59 }
  0xa4   :  { %v87_v61 = vshrl.u32 %v86_v60, 30 }
  0xa6   :  { %v88_v62 = vshll.u32 %v87_v61, 30  ;;  %v111_v20 = vsub.s32 4, %v87_v61 }
  0xa8   :  { %v89_v63 = vsub.s32 %v85_v59, %v88_v62  ;;  %v112_v23 = vsel %vm27_vm7, %v111_v20, %v87_v61 }
  0xa9   :  { %v114_v25 = vsel %vm26_vm8, 0, %v112_v23 }
  0xaa   :  { %v91_v0 = vsub.s32 0, %v89_v63  ;;  %v118_v26 = vadd.s32 3, %v114_v25  ;;  %v222_v28 = vand.u32 3, %v114_v25 }
  0xac   :  { %v270_v1 = vmin.u32 %v91_v0, %v89_v63  ;;  %v119_v27 = vand.u32 3, %v118_v26  ;;  %vm227_vm10 = vcmp.eq.s32.totalorder %v222_v28, 2  ;;  %vm224_vm12 = vcmp.eq.s32.totalorder %v222_v28, 0 }
  0xad   :  { %vm223_vm14 = vcmp.lt.s32.totalorder %v222_v28, 2 }
  0xae   :  { %v93_v2 = vclz %v270_v1  ;;  %vm124_vm9 = vcmp.eq.s32.totalorder %v119_v27, 2  ;;  %vm121_vm11 = vcmp.eq.s32.totalorder %v119_v27, 0  ;;  %vm120_vm13 = vcmp.lt.s32.totalorder %v119_v27, 2 }
  0xb0   :  { %v271_v4 = vadd.s32 4294967294, %v93_v2 }
  0xb2   :  { %vm272_vm6 = vcmp.lt.s32.totalorder %v271_v4, 0 }
  0xb3   :  { %v96_v6 = vsel %vm272_vm6, 0, %v271_v4 }
  0xb4   :  { %v97_v8 = vsub.s32 32, %v96_v6  ;;  %v101_v9 = vsub.s32 4294967266, %v96_v6  ;;  %v98_v11 = vshll.u32 %v89_v63, %v96_v6 }
  0xb6   :  { %v99_v12 = vshrl.u32 %v81_v7, %v97_v8  ;;  %v102_v13 = vadd.s32 127, %v101_v9 }
  0xb8   :  { %v100_v14 = vor.u32 %v99_v12, %v98_v11  ;;  %v103_v15 = vshll.u32 %v102_v13, 23 }
  0xba   :  { %v104_v16 = vor.u32 4788187, %v103_v15  ;;  %v107_v18 = vcvt.s32.f32 %v100_v14 }
  0xbc   :  { %v105_v17 = vand.u32 2147483647, %v104_v16 }
  0xbe   :  { %v108_v19 = vmul.f32 %v107_v18, %v105_v17 }
  0xc0   :  { %v109_v21 = vxor.u32 2147483648, %v108_v19 }
  0xc2   :  { %v110_v22 = vsel %vm27_vm7, %v109_v21, %v108_v19 }
  0xc3   :  { %v113_v24 = vsel %vm26_vm8, %v353_v5, %v110_v22 }
  0xc4   :  { %293 = vcosq.f32 %v113_v24 }
  0xc5   :  { %295 = vsinq.f32 %v113_v24 }
  0xce   :  { %v294_v29 = vpop.eup %293 }
  0xcf   :  { %v296_v30 = vpop.eup %295  ;;  %v125_v31 = vxor.u32 2147483648, %v294_v29 }
  0xd0   :  { %v122_v32 = vxor.u32 2147483648, %v296_v30 }
  0xd1   :  { %v126_v33 = vsel %vm124_vm9, %v125_v31, %v296_v30  ;;  %v229_v10 = vsel %vm227_vm10, %v125_v31, %v296_v30 }
  0xd2   :  { %v123_v36 = vsel %vm121_vm11, %v294_v29, %v122_v32  ;;  %v226_v37 = vsel %vm224_vm12, %v294_v29, %v122_v32 }
  0xd3   :  { %v127_v38 = vsel %vm120_vm13, %v123_v36, %v126_v33  ;;  %v230_v39 = vsel %vm223_vm14, %v226_v37, %v229_v10 }
  0xd4   :  { %v128_v41 = vsel %vm117_vm15, nan, %v127_v38  ;;  %v231_v42 = vsel %vm117_vm15, nan, %v230_v39 }
  0xd5   :  { %v237_v43 = vmul.f32 %v277_v34, %v128_v41  ;;  %v243_v44 = vmul.f32 %v278_v35, %v231_v42 }
  0xd7   :  { %v244_v45 = vadd.f32 %v243_v44, %v237_v43 }
  0xd9   :  { %v251_v47 = vadd.f32 %v250_v46, %v244_v45 }
  0xdb   :  { %253 = vst.msk [vmem:[#allocation2] sm:$0xff] %vm252_vm0, %v251_v47 }
  0xdc   :  { %308 = shalt.err (!%p305_p4)
}
  0xdd   :  { %s309_s22 = scalar_lea.hbm %s398_s2, 128 }
  0xde   :  { %p310_p5 = scmp.ne.s32.totalorder %s398_s2, %s309_s22  ;;  %p313_p6 = scmp.lt.u32.totalorder %s309_s22, %s398_s2 }
  0xe0   :  { %p315_p7 = pnand %p313_p6, %p310_p5 }
  0xe2   :  { %318 = shalt.err (!%p315_p7)
}
  0xe3   :  { %263 = dma.vmem_to_hbm [thread:$0]  %s261_s19, 128, %s398_s2, [#allocation3]  }
  0xe4   :  { %319 = dma.done.wait [#allocation3], 128  }
  0xe5   :  { %320 = vsyncadd [#allocation3], 4294967168 }
  0xe6   :  { %267 = vsyncpa [#allocation3], 1 }

</bundles_post_ra>
